<compile_context>
chip_gen: v7x
topology: tpu7x:2x2x1
jax: 0.10.0
libtpu: 0.0.40
codegen_flags: <defaults>
</compile_context>

<pallas_src>
import functools
import math

import jax
import jax.numpy as jnp
from jax.experimental import pallas as pl
from jax.experimental.pallas import tpu as pltpu


def _round_up(x: int, m: int) -> int:
    return (x + m - 1) // m * m


def _pick_tile(dim: int, candidates) -> int:
    """Largest candidate that evenly divides `dim` (candidates sorted desc)."""
    for c in candidates:
        if c <= dim and dim % c == 0:
            return c
    return dim


def prepare_delayline_params(weight, bias=None, *, compute_dtype=jnp.bfloat16):
    """One-time weight/bias preparation. Call ONCE and cache the result.

    weight: (D, D) in nn.Linear (out_features, in_features) layout.
    Returns the weight pre-transposed to (in, out), padded to a multiple of 128 in both
    dims and cast to `compute_dtype`, plus an f32 padded bias row and metadata.
    """
    D = weight.shape[0]
    assert weight.shape == (D, D)
    D_pad = _round_up(D, 128)
    # TODO(synk): for awkward D on v6e/v7x, consider padding to 256 granularity so tn/tk
    # can fill the 2x256^2 MXU; and add int8 (v6e) / fp8 (v7x) quantized-weight variants
    # here (dequantize in-kernel, f32 accumulate) for another ~2x HBM traffic reduction.
    w_t = jnp.transpose(weight)                         # (in, out) -> plain dot, no in-kernel transpose
    if D_pad != D:
        w_t = jnp.pad(w_t, ((0, D_pad - D), (0, D_pad - D)))
    w_t = w_t.astype(compute_dtype)

    if bias is None:
        b = jnp.zeros((D_pad,), jnp.float32)
    else:
        b = bias.astype(jnp.float32)
        if D_pad != D:
            b = jnp.pad(b, (0, D_pad - D))

    return {
        "w_t": w_t,                      # (D_pad, D_pad), (in, out), compute dtype
        "bias": b.reshape(1, D_pad),     # (1, D_pad), f32
        "d": D,
        "d_pad": D_pad,
        "compute_dtype": compute_dtype,
    }


def _single_block_kernel(*refs, skip_connection: bool):
    """Whole problem resident in VMEM: one matmul, fused bias/skip/downcast."""
    if skip_connection:
        x_ref, w_ref, b_ref, xs_ref, o_ref = refs
    else:
        x_ref, w_ref, b_ref, o_ref = refs
        xs_ref = None
    y = jnp.dot(x_ref[...], w_ref[...], preferred_element_type=jnp.float32)
    y = y + b_ref[...]
    if skip_connection:
        y = y + xs_ref[...].astype(jnp.float32)
    o_ref[...] = y.astype(o_ref.dtype)


def _tiled_kernel(*refs, skip_connection: bool):
    """M/N/K-tiled GEMM, f32 VMEM accumulator, epilogue fused into the last k step."""
    if skip_connection:
        x_ref, w_ref, b_ref, xs_ref, o_ref, acc_ref = refs
    else:
        x_ref, w_ref, b_ref, o_ref, acc_ref = refs
        xs_ref = None

    k = pl.program_id(2)
    nk = pl.num_programs(2)

    @pl.when(k == 0)
    def _():
        acc_ref[...] = jnp.zeros_like(acc_ref)

    # x tile (tm, tk) @ W^T tile (tk, tn) -> (tm, tn); feeds the MXU directly.
    partial = jnp.dot(x_ref[...], w_ref[...], preferred_element_type=jnp.float32)

    @pl.when(k < nk - 1)
    def _():
        acc_ref[...] += partial

    # Last reduction step: fold the final partial product straight into the epilogue
    # (saves one full (tm, tn) f32 accumulator store + reload).
    @pl.when(k == nk - 1)
    def _():
        y = acc_ref[...] + partial + b_ref[...]
        if skip_connection:
            y = y + xs_ref[...].astype(jnp.float32)
        o_ref[...] = y.astype(o_ref.dtype)


def delay_line_feedforward(inputs, params, *, skip_connection: bool = False,
                           force_tiled: bool = False,
                           tile_m=None, tile_n=None, tile_k=None):
    """inputs: (B, T, S); params: output of prepare_delayline_params (cached)."""
    B = inputs.shape[0]
    D = params["d"]
    D_pad = params["d_pad"]
    compute_dtype = params["compute_dtype"]
    assert math.prod(inputs.shape[1:]) == D

    x2d = inputs.reshape(B, D)                     # nn.Flatten()
    B_pad = _round_up(B, 8)
    pad_b, pad_d = B_pad - B, D_pad - D
    if pad_b or pad_d:
        x_skip = jnp.pad(x2d, ((0, pad_b), (0, pad_d)))   # tiny per-call pad (activation only)
    else:
        x_skip = x2d
    x_mm = x_skip.astype(compute_dtype)            # narrow-dtype copy for the MXU stream

    w_t = params["w_t"]
    b2d = params["bias"]
    out_dtype = inputs.dtype

    c_item = jnp.dtype(compute_dtype).itemsize
    in_item = jnp.dtype(inputs.dtype).itemsize

    # ---------------- small-problem fast path: single VMEM block ----------------
    resident_bytes = (D_pad * D_pad * c_item
                      + B_pad * D_pad * (c_item + in_item * (1 + int(skip_connection))))
    if not force_tiled and resident_bytes <= (4 << 20):
        operands = [x_mm, w_t, b2d] + ([x_skip] if skip_connection else [])
        kernel = functools.partial(_single_block_kernel, skip_connection=skip_connection)
        out2d = pl.pallas_call(
            kernel,
            out_shape=jax.ShapeDtypeStruct((B_pad, D_pad), out_dtype),
        )(*operands)
        return out2d[:B, :D].reshape(inputs.shape)

    # ---------------- tiled M/N/K GEMM ----------------
    # Big tm amortizes the dominant D^2 weight HBM stream (re-read B_pad/tm times).
    # Worst case (tm=1024, tk=2048, tn=512, f32 streams) is ~34 MiB of double-buffered
    # VMEM, within the 48 MiB limit (>=16 MiB headroom on v7x's 64 MiB VMEM).
    tm = tile_m or _pick_tile(B_pad, (1024, 512, 256, 128, 64, 32, 16, 8))
    tn = tile_n or _pick_tile(D_pad, (512, 256, 128))
    tk = tile_k or _pick_tile(D_pad, (2048, 1024, 512, 256, 128))

    # v7x megacore: if the batch grid collapses to 1, split N so the second TensorCore
    # still has a parallel axis of length >= 2.
    if tile_n is None and B_pad // tm == 1 and D_pad // tn == 1 and D_pad % 256 == 0:
        tn = max(128, tn // 2)

    grid = (B_pad // tm, D_pad // tn, D_pad // tk)   # reduction axis last

    in_specs = [
        pl.BlockSpec((tm, tk), lambda i, j, k: (i, k)),   # x (compute dtype) matmul operand
        # W pre-transposed to (in, out): plain dot, no per-tile transpose of the weight.
        # TODO(synk): if a trace shows exposed W DMA, add pipeline_mode=pl.Buffered(3).
        pl.BlockSpec((tk, tn), lambda i, j, k: (k, j)),
        pl.BlockSpec((1, tn), lambda i, j, k: (0, j)),    # bias row (f32)
    ]
    operands = [x_mm, w_t, b2d]
    if skip_connection:
        # Unmodified-dtype x tile aligned with the output tile for the in-kernel skip add.
        in_specs.append(pl.BlockSpec((tm, tn), lambda i, j, k: (i, j)))
        operands.append(x_skip)

    cost = pl.CostEstimate(
        flops=2 * B_pad * D_pad * D_pad,
        transcendentals=0,
        bytes_accessed=(
            D_pad * D_pad * c_item * (B_pad // tm)            # W re-streamed per i panel
            + B_pad * D_pad * c_item * (D_pad // tn)          # x re-streamed per j panel
            + B_pad * D_pad * in_item * (1 + int(skip_connection))  # output (+ skip read)
        ),
    )

    kernel = functools.partial(_tiled_kernel, skip_connection=skip_connection)
    out2d = pl.pallas_call(
        kernel,
        out_shape=jax.ShapeDtypeStruct((B_pad, D_pad), out_dtype),
        grid_spec=pltpu.PrefetchScalarGridSpec(
            num_scalar_prefetch=0,
            grid=grid,
            in_specs=in_specs,
            out_specs=pl.BlockSpec((tm, tn), lambda i, j, k: (i, j)),
            scratch_shapes=[pltpu.VMEM((tm, tn), jnp.float32)],
        ),
        compiler_params=pltpu.CompilerParams(
            dimension_semantics=("parallel", "parallel", "arbitrary"),
            vmem_limit_bytes=48 << 20,
        ),
        cost_estimate=cost,
    )(*operands)

    out2d = out2d[:B, :D]
    return out2d.reshape(inputs.shape)


if __name__ == "__main__":
    key = jax.random.PRNGKey(0)
    k_x, k_w, k_b, k_x2, k_w2, k_b2 = jax.random.split(key, 6)

    # Shapes consistent with the module: batch=2, n_time_steps=8, n_state_variables=4.
    B, T, S = 2, 8, 4
    D = T * S
    bound = 1.0 / float(D) ** 0.5
    x = jax.random.normal(k_x, (B, T, S), dtype=jnp.float32)
    W = jax.random.uniform(k_w, (D, D), minval=-bound, maxval=bound, dtype=jnp.float32)
    b = jax.random.uniform(k_b, (D,), minval=-bound, maxval=bound, dtype=jnp.float32)

    ref = (x.reshape(B, D) @ W.T + b).reshape(B, T, S) + x

    # 1) f32 streaming, single-block fast path (exact check).
    params_f32 = prepare_delayline_params(W, b, compute_dtype=jnp.float32)
    out_f32 = jax.block_until_ready(
        delay_line_feedforward(x, params_f32, skip_connection=True))
    assert out_f32.shape == x.shape
    assert jnp.allclose(out_f32, ref, atol=1e-5, rtol=1e-5)

    # 2) bf16 weight/activation streaming (production default), f32 accumulate.
    params_bf16 = prepare_delayline_params(W, b, compute_dtype=jnp.bfloat16)
    out_bf16 = jax.block_until_ready(
        delay_line_feedforward(x, params_bf16, skip_connection=True))
    ref_bf16 = (x.astype(jnp.bfloat16).astype(jnp.float32).reshape(B, D)
                @ W.astype(jnp.bfloat16).astype(jnp.float32).T + b).reshape(B, T, S) + x
    assert jnp.allclose(out_bf16, ref_bf16, atol=1e-2, rtol=1e-2)

    # 3) Exercise the tiled M/N/K path at small shapes (forced tiling so the
    #    k-accumulation + fused-epilogue code path is compiled and verified).
    B2, T2, S2 = 4, 16, 16
    D2 = T2 * S2
    bound2 = 1.0 / float(D2) ** 0.5
    x2 = jax.random.normal(k_x2, (B2, T2, S2), dtype=jnp.float32)
    W2 = jax.random.uniform(k_w2, (D2, D2), minval=-bound2, maxval=bound2, dtype=jnp.float32)
    b2 = jax.random.uniform(k_b2, (D2,), minval=-bound2, maxval=bound2, dtype=jnp.float32)
    params2 = prepare_delayline_params(W2, b2, compute_dtype=jnp.float32)
    out_tiled = jax.block_until_ready(
        delay_line_feedforward(x2, params2, skip_connection=True,
                               force_tiled=True, tile_m=8, tile_n=128, tile_k=128))
    ref2 = (x2.reshape(B2, D2) @ W2.T + b2).reshape(B2, T2, S2) + x2
    assert out_tiled.shape == x2.shape
    assert jnp.allclose(out_tiled, ref2, atol=1e-3, rtol=1e-3)

    print("KERNEL_OK")
</pallas_src>

<mosaic_0001>
module attributes {stable_mosaic.version = 11 : i64} {
  func.func @_single_block_kernel(%arg0: memref<8x128xf32, #tpu.memory_space<vmem>>, %arg1: memref<128x128xf32, #tpu.memory_space<vmem>>, %arg2: memref<1x128xf32, #tpu.memory_space<vmem>>, %arg3: memref<8x128xf32, #tpu.memory_space<vmem>>, %arg4: memref<8x128xf32, #tpu.memory_space<vmem>>) attributes {dimension_semantics = [], scalar_prefetch = 0 : i64, scratch_operands = 0 : i64, tpu.core_type = #tpu.core_type<tc>} {
    %c0 = arith.constant 0 : index
    %c0_0 = arith.constant 0 : index
    %0 = vector.load %arg0[%c0, %c0_0] : memref<8x128xf32, #tpu.memory_space<vmem>>, vector<8x128xf32>
    %c0_1 = arith.constant 0 : index
    %c0_2 = arith.constant 0 : index
    %1 = vector.load %arg1[%c0_1, %c0_2] : memref<128x128xf32, #tpu.memory_space<vmem>>, vector<128x128xf32>
    %cst = arith.constant dense<0.000000e+00> : vector<8x128xf32>
    %2 = tpu.matmul %0, %1, %cst {dimension_numbers = #tpu.dot_dimension_numbers<[1], [0], [0], [1], [0, 0, 1, 1], [], []>} : vector<8x128xf32>, vector<128x128xf32>, vector<8x128xf32> -> vector<8x128xf32>
    %c0_3 = arith.constant 0 : index
    %c0_4 = arith.constant 0 : index
    %3 = vector.load %arg2[%c0_3, %c0_4] : memref<1x128xf32, #tpu.memory_space<vmem>>, vector<1x128xf32>
    %4 = vector.broadcast %3 : vector<1x128xf32> to vector<8x128xf32>
    %5 = arith.addf %2, %4 : vector<8x128xf32>
    %c0_5 = arith.constant 0 : index
    %c0_6 = arith.constant 0 : index
    %6 = vector.load %arg3[%c0_5, %c0_6] : memref<8x128xf32, #tpu.memory_space<vmem>>, vector<8x128xf32>
    %7 = arith.addf %5, %6 : vector<8x128xf32>
    %c0_7 = arith.constant 0 : index
    %c0_8 = arith.constant 0 : index
    %8 = vector.load %arg4[%c0_7, %c0_8] : memref<8x128xf32, #tpu.memory_space<vmem>>, vector<8x128xf32>
    tpu.vector_store %arg4[%c0_7, %c0_8], %7 {strides = array<i32>} : memref<8x128xf32, #tpu.memory_space<vmem>>, vector<8x128xf32>,
    return
  }
}

</mosaic_0001>

<bundles_post_ra>
// kernel: tpu_custom_call.1
= control target key start
LH: loop header
LB: loop body
LE: loop exit
PB: predicated region body
PF: predicated region fallthrough
CT: control target
= control target key end

     0   :  { %9 = vsyncpa [#allocation3], 0  ;;  %s396_s0 = inlined_call_operand.hbm [shape: f32[8,128], index: 0, kind: input, shape index: {}]   ;;  %s397_s1 = inlined_call_operand.hbm [shape: f32[128,128], index: 1, kind: input, shape index: {}]   ;;  %s398_s2 = inlined_call_operand.vmem [shape: f32[1,128], index: 2, kind: input, shape index: {}]   ;;  %s399_s3 = inlined_call_operand.vmem [shape: f32[8,128], index: 3, kind: input, shape index: {}]   ;;  %s400_s4 = inlined_call_operand.hbm [shape: f32[8,128], index: 4, kind: output, shape index: {}]  }
   0x1   :  { %10 = vsyncpa [#allocation6], 0 }
   0x2   :  { %11 = vsyncpa [#allocation4], 0  ;;  %s314_s15 = smov [#allocation2]   ;;  %s315_s17 = smov [#allocation5]  }
   0x3   :  { %s18_s16 = sshll.u32 %s314_s15, 4  ;;  %s27_s18 = sshll.u32 %s315_s17, 4  ;;  %s19_s16 = int_to_ptr.vmem [resolvable:$true] %s18_s16  ;;  %s347_s18 = int_to_ptr.vmem [resolvable:$true] %s27_s18 }
   0x4   :  { %s242_s21 = scalar_lea.hbm %s396_s0, 128 }
   0x5   :  { %p243_p0 = scmp.ne.s32.totalorder %s396_s0, %s242_s21  ;;  %p246_p1 = scmp.lt.u32.totalorder %s242_s21, %s396_s0 }
   0x7   :  { %p248_p2 = pnand %p246_p1, %p243_p0 }
   0x9   :  { %251 = shalt.err (!%p248_p2)
}
   0xa   :  { %s252_s26 = scalar_lea.vmem %s19_s16, 128  ;;  %p257_p4 = scmp.lt.s32.totalorder %s19_s16, %s19_s16 }
   0xb   :  { %p253_p3 = scmp.ne.s32.totalorder %s19_s16, %s252_s26  ;;  %p258_p5 = scmp.lt.s32.totalorder %s252_s26, %s252_s26 }
   0xd   :  { %p259_p6 = por %p258_p5, %p257_p4 }
   0xf   :  { %p260_p7 = pnand %p259_p6, %p253_p3 }
  0x11   :  { %263 = shalt.err (!%p260_p7)
}
  0x12   :  { %21 = dma.hbm_to_vmem [thread:$0]  %s396_s0, 128, %s19_s16, [#allocation3]  }
  0x13   :  { %s264_s5 = scalar_lea.hbm %s397_s1, 2048 }
  0x14   :  { %p265_p8 = scmp.ne.s32.totalorder %s397_s1, %s264_s5  ;;  %p268_p9 = scmp.lt.u32.totalorder %s264_s5, %s397_s1 }
  0x16   :  { %p270_p10 = pnand %p268_p9, %p265_p8 }
  0x18   :  { %273 = shalt.err (!%p270_p10)
}
  0x19   :  { %s274_s10 = scalar_lea.vmem %s347_s18, 2048  ;;  %p279_p12 = scmp.lt.s32.totalorder %s347_s18, %s347_s18 }
  0x1a   :  { %p275_p11 = scmp.ne.s32.totalorder %s347_s18, %s274_s10  ;;  %p280_p13 = scmp.lt.s32.totalorder %s274_s10, %s274_s10 }
  0x1c   :  { %p281_p0 = por %p280_p13, %p279_p12 }
  0x1e   :  { %p282_p1 = pnand %p281_p0, %p275_p11 }
  0x20   :  { %285 = shalt.err (!%p282_p1)
}
  0x21   :  { %s316_s0 = smov 128   ;;  %s317_s11 = smov 8  }
  0x22   :  { %33 = dma.hbm_to_vmem [thread:$0]  %s397_s1, 2048, %s347_s18, [#allocation6], %s316_s0, %s316_s0, %s317_s11  }
  0x23   :  { %308 = dma.done.wait [#allocation3], 128  }
  0x24   :  { %309 = vsyncadd [#allocation3], 4294967168 }
  0x25   :  { %310 = dma.done.wait [#allocation6], 2048  }
  0x26   :  { %311 = vsyncadd [#allocation6], 4294965248  ;;  %v318_v0 = vmov 0.0|0.0   ;;  %vm319_vm0 = vmmov 0   ;;  %v320_v1 = vmov 0.0   ;;  %v45_v2 = vld [vmem:[#allocation5] sm:$0xff] }
  0x27   :  { %210 = vmatprep.subr.bf16.mxu0 %v318_v0  ;;  %207 = vmatprep.mubr.msk.f32.mxu0 %vm319_vm0, %v320_v1  ;;  %v46_v3 = vld [vmem:[#allocation5 + $0x8] sm:$0xff]  ;;  %v47_v4 = vld [vmem:[#allocation5 + $0x10] sm:$0xff]  ;;  %v48_v6 = vld [vmem:[#allocation5 + $0x18] sm:$0xff]  ;;  %s321_s17 = smov [#allocation7]  }
  0x28   :  { %v211_v5 = vpack.c.bf16 %v46_v3, %v45_v2  ;;  %v214_v7 = vpack.c.bf16 %v48_v6, %v47_v4  ;;  %v49_v8 = vld [vmem:[#allocation5 + $0x20] sm:$0xff]  ;;  %v50_v9 = vld [vmem:[#allocation5 + $0x28] sm:$0xff]  ;;  %v51_v11 = vld [vmem:[#allocation5 + $0x30] sm:$0xff]  ;;  %s147_s18 = sshll.u32 %s321_s17, 4  ;;  %s148_s18 = int_to_ptr.vmem [resolvable:$true] %s147_s18 }
  0x29   :  { %v217_v10 = vpack.c.bf16 %v50_v9, %v49_v8  ;;  %v52_v12 = vld [vmem:[#allocation5 + $0x38] sm:$0xff]  ;;  %v53_v14 = vld [vmem:[#allocation5 + $0x40] sm:$0xff]  ;;  %v54_v15 = vld [vmem:[#allocation5 + $0x48] sm:$0xff]  ;;  %s286_s19 = scalar_lea.vmem %s148_s18, 128  ;;  %p291_p3 = scmp.lt.s32.totalorder %s148_s18, %s148_s18 }
  0x2a   :  { %212 = vmatpush3.bf16.msra.mxu0 %v211_v5  ;;  %v220_v13 = vpack.c.bf16 %v52_v12, %v51_v11  ;;  %v223_v16 = vpack.c.bf16 %v54_v15, %v53_v14  ;;  %v55_v17 = vld [vmem:[#allocation5 + $0x50] sm:$0xff]  ;;  %v56_v18 = vld [vmem:[#allocation5 + $0x58] sm:$0xff]  ;;  %v57_v20 = vld [vmem:[#allocation5 + $0x60] sm:$0xff]  ;;  %p287_p2 = scmp.ne.s32.totalorder %s148_s18, %s286_s19  ;;  %p292_p4 = scmp.lt.s32.totalorder %s286_s19, %s286_s19 }
  0x2b   :  { %213 = vmatprep.subr.bf16.mxu0 %v318_v0  ;;  %v226_v19 = vpack.c.bf16 %v56_v18, %v55_v17  ;;  %v58_v21 = vld [vmem:[#allocation5 + $0x68] sm:$0xff]  ;;  %v59_v23 = vld [vmem:[#allocation5 + $0x70] sm:$0xff]  ;;  %v60_v24 = vld [vmem:[#allocation5 + $0x78] sm:$0xff] }
  0x2c   :  { %v229_v22 = vpack.c.bf16 %v58_v21, %v57_v20  ;;  %v232_v25 = vpack.c.bf16 %v60_v24, %v59_v23  ;;  %v44_v26 = vld [vmem:[#allocation2] sm:$0xff]  ;;  %p293_p5 = por %p292_p4, %p291_p3 }
  0x2d   :  { %v157_v27 = vld [vmem:[%s398_s2] ss:$0 sm:$0xff] }
  0x2e   :  { %215 = vmatpush3.bf16.msra.mxu0 %v214_v7  ;;  %v138_v29 = vld [vmem:[%s399_s3] sm:$0xff]  ;;  %p294_p6 = pnand %p293_p5, %p287_p2 }
  0x2f   :  { %216 = vmatprep.subr.bf16.mxu0 %v318_v0 }
  0x32   :  { %218 = vmatpush3.bf16.msra.mxu0 %v217_v10 }
  0x33   :  { %219 = vmatprep.subr.bf16.mxu0 %v318_v0 }
  0x36   :  { %221 = vmatpush3.bf16.msra.mxu0 %v220_v13 }
  0x37   :  { %222 = vmatprep.subr.bf16.mxu0 %v318_v0 }
  0x3a   :  { %224 = vmatpush3.bf16.msra.mxu0 %v223_v16 }
  0x3b   :  { %225 = vmatprep.subr.bf16.mxu0 %v318_v0 }
  0x3e   :  { %227 = vmatpush3.bf16.msra.mxu0 %v226_v19 }
  0x3f   :  { %228 = vmatprep.subr.bf16.mxu0 %v318_v0 }
  0x42   :  { %230 = vmatpush3.bf16.msra.mxu0 %v229_v22 }
  0x43   :  { %231 = vmatprep.subr.bf16.mxu0 %v318_v0 }
  0x46   :  { %233 = vmatpush3.bf16.msra.mxu0 %v232_v25 }
  0x49   :  { %208 = vmatmul.mubr.f32.vlgmr.msra.gmra.mrb[0].mxu0 %v44_v26 }
 0x11c   :  { %v134_v28 = vpop.f32.mrb[0].mxu0 }
 0x11d   :  { %v135_v30 = vadd.f32 %v157_v27, %v134_v28  ;;  %v209_v31 = vpop.f32.mrb[1].mxu0 }
 0x11f   :  { %v139_v32 = vadd.f32 %v138_v29, %v135_v30 }
 0x121   :  { %140 = vst [vmem:[#allocation7] sm:$0xff] %v139_v32 }
 0x122   :  { %297 = shalt.err (!%p294_p6)
}
 0x123   :  { %s298_s21 = scalar_lea.hbm %s400_s4, 128 }
 0x124   :  { %p299_p7 = scmp.ne.s32.totalorder %s400_s4, %s298_s21  ;;  %p302_p8 = scmp.lt.u32.totalorder %s298_s21, %s400_s4 }
 0x126   :  { %p304_p9 = pnand %p302_p8, %p299_p7 }
 0x128   :  { %307 = shalt.err (!%p304_p9)
}
 0x129   :  { %150 = dma.vmem_to_hbm [thread:$0]  %s148_s18, 128, %s400_s4, [#allocation4]  }
 0x12a   :  { %312 = dma.done.wait [#allocation4], 128  }
 0x12b   :  { %313 = vsyncadd [#allocation4], 4294967168 }
 0x12c   :  { %154 = vsyncpa [#allocation3], 1 }
 0x12d   :  { %155 = vsyncpa [#allocation6], 1 }
 0x12e   :  { %156 = vsyncpa [#allocation4], 1 }

</bundles_post_ra>
